<compile_context>
chip_gen: v6e
topology: v6e:2x2x1
jax: 0.10.0
libtpu: 0.0.40
codegen_flags: <defaults>
</compile_context>

<pallas_src>
import functools

import jax
import jax.numpy as jnp
from jax.experimental import pallas as pl
from jax.experimental.pallas import tpu as pltpu


def _round_up(x, m):
    return (x + m - 1) // m * m


def gnn_encoder_kernel(a_ref, d_ref, x_ref, w1_ref, b1_ref, w3_ref, b3_ref,
                       o_ref, *, n, eps):
    """One graph per grid step: GCNConv+ReLU, GCNConv+ReLU, mean/var normalize.

    A_hat @ M is evaluated as D @ (A @ (D @ M)) with A the exact 0/1 (+ self
    loop) adjacency stored in bf16 and D = diag(d_inv_sqrt) applied as row
    scalings on the narrow (N, d) operands (VPU), never on the N x N matrix.
    """
    n_p = x_ref.shape[0]
    f_p = x_ref.shape[1]
    h_p = w1_ref.shape[1]
    o_p = w3_ref.shape[1]

    a = a_ref[...].astype(jnp.float32)   # exact upcast: A holds only 0.0 / 1.0
    d = d_ref[...]                       # (Np, 1) D^-1/2, zero on padded rows
    x = x_ref[...]                       # (Np, Fp)

    # ---- Layer 1: relu(A_hat @ (X @ W1) + b1) ----
    xs = x * d
    if f_p <= h_p:
        # A-matmul on the narrower (N, Fp) operand, W1 applied afterwards.
        t = jnp.dot(a, xs, preferred_element_type=jnp.float32)
        h = jnp.dot(t * d, w1_ref[...], preferred_element_type=jnp.float32)
    else:
        xw = jnp.dot(xs, w1_ref[...], preferred_element_type=jnp.float32)
        h = d * jnp.dot(a, xw, preferred_element_type=jnp.float32)
    h = jnp.maximum(h + b1_ref[...], 0.0)

    # ---- Layer 2 (the reference forward() skips conv2): relu(A_hat@(h@W3)+b3)
    hs = h * d
    if o_p <= h_p:
        hw = jnp.dot(hs, w3_ref[...], preferred_element_type=jnp.float32)
        h2 = d * jnp.dot(a, hw, preferred_element_type=jnp.float32)
    else:
        t = jnp.dot(a, hs, preferred_element_type=jnp.float32)
        h2 = jnp.dot(t * d, w3_ref[...], preferred_element_type=jnp.float32)
    h2 = jnp.maximum(h2 + b3_ref[...], 0.0)          # (Np, Op)

    # ---- Normalizer: column mean / population variance over the n real rows.
    # n is a static Python int, so masking vanishes when n == n_p.
    if n < n_p:
        row_ok = jax.lax.broadcasted_iota(jnp.int32, (n_p, 1), 0) < n
        h2 = jnp.where(row_ok, h2, 0.0)              # zero padded rows once
    inv_n = 1.0 / float(n)
    mean = jnp.sum(h2, axis=0, keepdims=True) * inv_n          # XLU reduce
    c = h2 - mean
    cm = jnp.where(row_ok, c, 0.0) if n < n_p else c
    var = jnp.maximum(jnp.sum(cm * cm, axis=0, keepdims=True) * inv_n, eps)
    o_ref[...] = c * jax.lax.rsqrt(var)              # lane-dense full store


def gnn_encoder_forward_batched(xs, edge_indices, params, eps=0.01):
    """xs: (G, N, F) f32, edge_indices: (G, 2, E) int32 -> (G, N, output_dim)."""
    w1, b1, w3, b3 = params
    g, n, f = xs.shape
    h_dim = w1.shape[1]
    o_dim = w3.shape[1]

    n_p = max(_round_up(n, 8), 8)
    f_p = _round_up(f, 128)
    h_p = _round_up(h_dim, 128)
    o_p = _round_up(o_dim, 128)

    # Raw 0/1 adjacency with self loops (exact in bf16) + D^-1/2 vector; the
    # GCN normalization is applied inside the kernel as row scalings, so no
    # O(N^2) elementwise pass / f32 A_hat is ever materialized.
    idx = jnp.arange(n)

    def build_adj(edge_index):
        a = jnp.zeros((n_p, n_p), jnp.float32)
        a = a.at[edge_index[1], edge_index[0]].set(1.0)   # message j -> i
        a = a.at[idx, idx].set(1.0)                       # self loops (real nodes)
        deg = jnp.sum(a, axis=1)
        d = jnp.where(deg > 0, jax.lax.rsqrt(deg), 0.0)
        return a.astype(jnp.bfloat16), d[:, None]

    a_b, d_b = jax.vmap(build_adj)(edge_indices)          # (G,Np,Np) bf16, (G,Np,1) f32

    x_b = jnp.zeros((g, n_p, f_p), jnp.float32).at[:, :n, :f].set(xs.astype(jnp.float32))
    w1_p = jnp.zeros((f_p, h_p), jnp.float32).at[:f, :h_dim].set(w1)
    b1_p = jnp.zeros((1, h_p), jnp.float32).at[:, :h_dim].set(b1)
    w3_p = jnp.zeros((h_p, o_p), jnp.float32).at[:h_dim, :o_dim].set(w3)
    b3_p = jnp.zeros((1, o_p), jnp.float32).at[:, :o_dim].set(b3)

    # Explicit VMEM budget: double-buffered per-graph blocks + weights +
    # intermediate slabs + headroom.
    per_graph = n_p * n_p * 2 + n_p * f_p * 4 + n_p * 4 + n_p * o_p * 4
    weights = (f_p * h_p + h_p + h_p * o_p + o_p) * 4
    interm = (n_p * n_p + n_p * f_p + 2 * n_p * h_p + 2 * n_p * o_p) * 4
    vmem_bytes = int(min(2 * (per_graph + weights) + interm + (4 << 20),
                         100 * 1024 * 1024))

    def graph_block(r, c):   # per-graph block, leading graph axis squeezed
        return pl.BlockSpec((None, r, c), lambda i: (i, 0, 0))

    def pinned(r, c):        # same weight block at every grid step
        return pl.BlockSpec((r, c), lambda i: (0, 0))

    out = pl.pallas_call(
        functools.partial(gnn_encoder_kernel, n=int(n), eps=float(eps)),
        grid=(g,),
        out_shape=jax.ShapeDtypeStruct((g, n_p, o_p), jnp.float32),
        in_specs=[
            graph_block(n_p, n_p),   # A   (bf16, exact 0/1 + self loops)
            graph_block(n_p, 1),     # d_inv_sqrt
            graph_block(n_p, f_p),   # X
            pinned(f_p, h_p),        # W1
            pinned(1, h_p),          # b1
            pinned(h_p, o_p),        # W3
            pinned(1, o_p),          # b3
        ],
        out_specs=graph_block(n_p, o_p),
        compiler_params=pltpu.CompilerParams(
            dimension_semantics=("parallel",),   # graphs independent (2 TCs on v7x)
            vmem_limit_bytes=vmem_bytes),
    )(a_b, d_b, x_b, w1_p, b1_p, w3_p, b3_p)

    return out[:, :n, :o_dim]


def gnn_encoder_forward(x, edge_index, params, eps=0.01):
    """Single-graph convenience wrapper: x (N, F), edge_index (2, E)."""
    return gnn_encoder_forward_batched(x[None], edge_index[None], params, eps)[0]


def init_gnn_params(key, num_features, hidden_dim, output_dim):
    """Deterministic parameter init; weights stored as (in_features, out_features)."""
    k1, k2, k3, k4 = jax.random.split(key, 4)

    def lin(kw, kb, fan_in, fan_out):
        bound = 1.0 / float(fan_in) ** 0.5
        w = jax.random.uniform(kw, (fan_in, fan_out), jnp.float32, -bound, bound)
        b = jax.random.uniform(kb, (1, fan_out), jnp.float32, -bound, bound)
        return w, b

    w1, b1 = lin(k1, k2, num_features, hidden_dim)
    w3, b3 = lin(k3, k4, hidden_dim, output_dim)
    return (w1, b1, w3, b3)


def gnn_encoder_ref(x, edge_index, params, eps=0.01):
    """Pure-JAX reference: dense GCN layers + sequential Welford normalizer."""
    w1, b1, w3, b3 = params
    n = x.shape[0]
    a = jnp.zeros((n, n), jnp.float32).at[edge_index[1], edge_index[0]].set(1.0)
    idx = jnp.arange(n)
    a = a.at[idx, idx].set(1.0)
    deg = jnp.sum(a, axis=1)
    d_inv_sqrt = jnp.where(deg > 0, 1.0 / jnp.sqrt(deg), 0.0)
    a_hat = a * d_inv_sqrt[:, None] * d_inv_sqrt[None, :]

    h = jnp.maximum(a_hat @ (x @ w1) + b1, 0.0)
    h = jnp.maximum(a_hat @ (h @ w3) + b3, 0.0)

    # Sequential Welford observe (fresh normalizer), then normalize with final stats.
    d = h.shape[1]
    mean = jnp.zeros((d,), jnp.float32)
    mean_diff = jnp.zeros((d,), jnp.float32)
    for i in range(n):
        last_mean = mean
        cnt = float(i + 1)
        mean = mean + (h[i] - mean) / cnt
        mean_diff = mean_diff + (h[i] - last_mean) * (h[i] - mean)
    var = jnp.maximum(mean_diff / float(n), eps)
    return (h - mean[None, :]) / jnp.sqrt(var[None, :])


if __name__ == "__main__":
    num_features, hidden_dim, output_dim = 16, 64, 32
    num_graphs, num_nodes, num_edges = 3, 12, 24

    key = jax.random.PRNGKey(0)
    kx, ks, kd, kp = jax.random.split(key, 4)

    xs = jax.random.normal(kx, (num_graphs, num_nodes, num_features), jnp.float32)
    src = jax.random.randint(ks, (num_graphs, num_edges), 0, num_nodes, dtype=jnp.int32)
    dst = jax.random.randint(kd, (num_graphs, num_edges), 0, num_nodes, dtype=jnp.int32)
    edge_indices = jnp.stack([src, dst], axis=1)          # (G, 2, E)

    params = init_gnn_params(kp, num_features, hidden_dim, output_dim)

    y = gnn_encoder_forward_batched(xs, edge_indices, params)
    y = jax.block_until_ready(y)
    assert y.shape == (num_graphs, num_nodes, output_dim)

    for gi in range(num_graphs):
        y_ref = gnn_encoder_ref(xs[gi], edge_indices[gi], params)
        err = float(jnp.max(jnp.abs(y[gi] - y_ref)))
        assert jnp.allclose(y[gi], y_ref, atol=1e-4, rtol=1e-4), (gi, err)

    print("KERNEL_OK")
</pallas_src>

<mosaic_0001>
module attributes {stable_mosaic.version = 11 : i64} {
  func.func @gnn_encoder_kernel(%arg0: i32, %arg1: memref<1x16x16xbf16, #tpu.memory_space<vmem>>, %arg2: memref<1x16x1xf32, #tpu.memory_space<vmem>>, %arg3: memref<1x16x128xf32, #tpu.memory_space<vmem>>, %arg4: memref<128x128xf32, #tpu.memory_space<vmem>>, %arg5: memref<1x128xf32, #tpu.memory_space<vmem>>, %arg6: memref<128x128xf32, #tpu.memory_space<vmem>>, %arg7: memref<1x128xf32, #tpu.memory_space<vmem>>, %arg8: memref<1x16x128xf32, #tpu.memory_space<vmem>>) attributes {dimension_semantics = [#tpu.dimension_semantics<parallel>], iteration_bounds = array<i64: 3>, scalar_prefetch = 0 : i64, scratch_operands = 0 : i64, tpu.core_type = #tpu.core_type<tc>, window_params = [{transform_indices = @transform_0, window_bounds = array<i64: 1, 16, 16>}, {transform_indices = @transform_1, window_bounds = array<i64: 1, 16, 1>}, {transform_indices = @transform_2, window_bounds = array<i64: 1, 16, 128>}, {pipeline_mode = #tpu.pipeline_mode<synchronous>, transform_indices = @transform_3, window_bounds = array<i64: 128, 128>}, {pipeline_mode = #tpu.pipeline_mode<synchronous>, transform_indices = @transform_4, window_bounds = array<i64: 1, 128>}, {pipeline_mode = #tpu.pipeline_mode<synchronous>, transform_indices = @transform_5, window_bounds = array<i64: 128, 128>}, {pipeline_mode = #tpu.pipeline_mode<synchronous>, transform_indices = @transform_6, window_bounds = array<i64: 1, 128>}, {transform_indices = @transform_7, window_bounds = array<i64: 1, 16, 128>}]} {
    %c0 = arith.constant 0 : index
    %c0_0 = arith.constant 0 : index
    %c0_1 = arith.constant 0 : index
    %0 = vector.load %arg1[%c0, %c0_0, %c0_1] : memref<1x16x16xbf16, #tpu.memory_space<vmem>>, vector<1x16x16xbf16>
    %1 = vector.shape_cast %0 : vector<1x16x16xbf16> to vector<16x16xbf16>
    %2 = arith.extf %1 : vector<16x16xbf16> to vector<16x16xf32>
    %c0_2 = arith.constant 0 : index
    %c0_3 = arith.constant 0 : index
    %c0_4 = arith.constant 0 : index
    %3 = vector.load %arg2[%c0_2, %c0_3, %c0_4] : memref<1x16x1xf32, #tpu.memory_space<vmem>>, vector<1x16x1xf32>
    %4 = vector.shape_cast %3 : vector<1x16x1xf32> to vector<16x1xf32>
    %c0_5 = arith.constant 0 : index
    %c0_6 = arith.constant 0 : index
    %c0_7 = arith.constant 0 : index
    %5 = vector.load %arg3[%c0_5, %c0_6, %c0_7] : memref<1x16x128xf32, #tpu.memory_space<vmem>>, vector<1x16x128xf32>
    %6 = vector.shape_cast %5 : vector<1x16x128xf32> to vector<16x128xf32>
    %7 = vector.broadcast %4 : vector<16x1xf32> to vector<16x128xf32>
    %8 = arith.mulf %6, %7 : vector<16x128xf32>
    %cst = arith.constant dense<0.000000e+00> : vector<16x128xf32>
    %9 = tpu.matmul %2, %8, %cst {dimension_numbers = #tpu.dot_dimension_numbers<[1], [0], [0], [1], [0, 0, 1, 1], [], []>} : vector<16x16xf32>, vector<16x128xf32>, vector<16x128xf32> -> vector<16x128xf32>
    %10 = vector.broadcast %4 : vector<16x1xf32> to vector<16x128xf32>
    %11 = arith.mulf %9, %10 : vector<16x128xf32>
    %c0_8 = arith.constant 0 : index
    %c0_9 = arith.constant 0 : index
    %12 = vector.load %arg4[%c0_8, %c0_9] : memref<128x128xf32, #tpu.memory_space<vmem>>, vector<128x128xf32>
    %cst_10 = arith.constant dense<0.000000e+00> : vector<16x128xf32>
    %13 = tpu.matmul %11, %12, %cst_10 {dimension_numbers = #tpu.dot_dimension_numbers<[1], [0], [0], [1], [0, 0, 1, 1], [], []>} : vector<16x128xf32>, vector<128x128xf32>, vector<16x128xf32> -> vector<16x128xf32>
    %c0_11 = arith.constant 0 : index
    %c0_12 = arith.constant 0 : index
    %14 = vector.load %arg5[%c0_11, %c0_12] : memref<1x128xf32, #tpu.memory_space<vmem>>, vector<1x128xf32>
    %15 = vector.broadcast %14 : vector<1x128xf32> to vector<16x128xf32>
    %16 = arith.addf %13, %15 : vector<16x128xf32>
    %cst_13 = arith.constant 0.000000e+00 : f32
    %17 = vector.broadcast %cst_13 : f32 to vector<16x128xf32>
    %18 = arith.maximumf %16, %17 : vector<16x128xf32>
    %19 = vector.broadcast %4 : vector<16x1xf32> to vector<16x128xf32>
    %20 = arith.mulf %18, %19 : vector<16x128xf32>
    %c0_14 = arith.constant 0 : index
    %c0_15 = arith.constant 0 : index
    %21 = vector.load %arg6[%c0_14, %c0_15] : memref<128x128xf32, #tpu.memory_space<vmem>>, vector<128x128xf32>
    %cst_16 = arith.constant dense<0.000000e+00> : vector<16x128xf32>
    %22 = tpu.matmul %20, %21, %cst_16 {dimension_numbers = #tpu.dot_dimension_numbers<[1], [0], [0], [1], [0, 0, 1, 1], [], []>} : vector<16x128xf32>, vector<128x128xf32>, vector<16x128xf32> -> vector<16x128xf32>
    %cst_17 = arith.constant dense<0.000000e+00> : vector<16x128xf32>
    %23 = tpu.matmul %2, %22, %cst_17 {dimension_numbers = #tpu.dot_dimension_numbers<[1], [0], [0], [1], [0, 0, 1, 1], [], []>} : vector<16x16xf32>, vector<16x128xf32>, vector<16x128xf32> -> vector<16x128xf32>
    %24 = vector.broadcast %4 : vector<16x1xf32> to vector<16x128xf32>
    %25 = arith.mulf %24, %23 : vector<16x128xf32>
    %c0_18 = arith.constant 0 : index
    %c0_19 = arith.constant 0 : index
    %26 = vector.load %arg7[%c0_18, %c0_19] : memref<1x128xf32, #tpu.memory_space<vmem>>, vector<1x128xf32>
    %27 = vector.broadcast %26 : vector<1x128xf32> to vector<16x128xf32>
    %28 = arith.addf %25, %27 : vector<16x128xf32>
    %cst_20 = arith.constant 0.000000e+00 : f32
    %29 = vector.broadcast %cst_20 : f32 to vector<16x128xf32>
    %30 = arith.maximumf %28, %29 : vector<16x128xf32>
    %31 = tpu.iota {dimensions = array<i32: 0>} : vector<16x1xi32>
    %c12_i32 = arith.constant 12 : i32
    %32 = vector.broadcast %c12_i32 : i32 to vector<16x1xi32>
    %33 = arith.cmpi slt, %31, %32 : vector<16x1xi32>
    %cst_21 = arith.constant 0.000000e+00 : f32
    %34 = vector.shape_cast %33 : vector<16x1xi1> to vector<16x1xi1>
    %35 = vector.broadcast %34 : vector<16x1xi1> to vector<16x128xi1>
    %36 = vector.broadcast %cst_21 : f32 to vector<16x128xf32>
    %37 = arith.select %35, %30, %36 : vector<16x128xi1>, vector<16x128xf32>
    %cst_22 = arith.constant dense<0.000000e+00> : vector<128xf32>
    %38 = vector.multi_reduction <add>, %37, %cst_22 [0] : vector<16x128xf32> to vector<128xf32>
    %39 = vector.shape_cast %38 : vector<128xf32> to vector<1x128xf32>
    %cst_23 = arith.constant 0.0833333358 : f32
    %40 = vector.broadcast %cst_23 : f32 to vector<1x128xf32>
    %41 = arith.mulf %39, %40 : vector<1x128xf32>
    %42 = vector.broadcast %41 : vector<1x128xf32> to vector<16x128xf32>
    %43 = arith.subf %37, %42 : vector<16x128xf32>
    %cst_24 = arith.constant 0.000000e+00 : f32
    %44 = vector.shape_cast %33 : vector<16x1xi1> to vector<16x1xi1>
    %45 = vector.broadcast %44 : vector<16x1xi1> to vector<16x128xi1>
    %46 = vector.broadcast %cst_24 : f32 to vector<16x128xf32>
    %47 = arith.select %45, %43, %46 : vector<16x128xi1>, vector<16x128xf32>
    %48 = arith.mulf %47, %47 : vector<16x128xf32>
    %cst_25 = arith.constant dense<0.000000e+00> : vector<128xf32>
    %49 = vector.multi_reduction <add>, %48, %cst_25 [0] : vector<16x128xf32> to vector<128xf32>
    %50 = vector.shape_cast %49 : vector<128xf32> to vector<1x128xf32>
    %cst_26 = arith.constant 0.0833333358 : f32
    %51 = vector.broadcast %cst_26 : f32 to vector<1x128xf32>
    %52 = arith.mulf %50, %51 : vector<1x128xf32>
    %cst_27 = arith.constant 0.00999999977 : f32
    %53 = vector.broadcast %cst_27 : f32 to vector<1x128xf32>
    %54 = arith.maximumf %52, %53 : vector<1x128xf32>
    %55 = math.rsqrt %54 : vector<1x128xf32>
    %56 = vector.broadcast %55 : vector<1x128xf32> to vector<16x128xf32>
    %57 = arith.mulf %43, %56 : vector<16x128xf32>
    %c0_28 = arith.constant 0 : index
    %c0_29 = arith.constant 0 : index
    %c0_30 = arith.constant 0 : index
    %58 = vector.load %arg8[%c0_28, %c0_29, %c0_30] : memref<1x16x128xf32, #tpu.memory_space<vmem>>, vector<1x16x128xf32>
    %59 = vector.shape_cast %58 : vector<1x16x128xf32> to vector<16x128xf32>
    %60 = vector.shape_cast %57 : vector<16x128xf32> to vector<1x16x128xf32>
    tpu.vector_store %arg8[%c0_28, %c0_29, %c0_30], %60 {strides = array<i32>} : memref<1x16x128xf32, #tpu.memory_space<vmem>>, vector<1x16x128xf32>,
    return
  }
  func.func @transform_0(%arg0: i32) -> (i32, i32, i32) {
    %c0_i32 = arith.constant 0 : i32
    %c0_i32_0 = arith.constant 0 : i32
    %c0_i32_1 = arith.constant 0 : i32
    return %arg0, %c0_i32, %c0_i32_0 : i32, i32, i32
  }
  func.func @transform_1(%arg0: i32) -> (i32, i32, i32) {
    %c0_i32 = arith.constant 0 : i32
    %c0_i32_0 = arith.constant 0 : i32
    %c0_i32_1 = arith.constant 0 : i32
    return %arg0, %c0_i32, %c0_i32_0 : i32, i32, i32
  }
  func.func @transform_2(%arg0: i32) -> (i32, i32, i32) {
    %c0_i32 = arith.constant 0 : i32
    %c0_i32_0 = arith.constant 0 : i32
    %c0_i32_1 = arith.constant 0 : i32
    return %arg0, %c0_i32, %c0_i32_0 : i32, i32, i32
  }
  func.func @transform_3(%arg0: i32) -> (i32, i32) {
    %c0_i32 = arith.constant 0 : i32
    %c0_i32_0 = arith.constant 0 : i32
    %c0_i32_1 = arith.constant 0 : i32
    return %c0_i32, %c0_i32_0 : i32, i32
  }
  func.func @transform_4(%arg0: i32) -> (i32, i32) {
    %c0_i32 = arith.constant 0 : i32
    %c0_i32_0 = arith.constant 0 : i32
    %c0_i32_1 = arith.constant 0 : i32
    return %c0_i32, %c0_i32_0 : i32, i32
  }
  func.func @transform_5(%arg0: i32) -> (i32, i32) {
    %c0_i32 = arith.constant 0 : i32
    %c0_i32_0 = arith.constant 0 : i32
    %c0_i32_1 = arith.constant 0 : i32
    return %c0_i32, %c0_i32_0 : i32, i32
  }
  func.func @transform_6(%arg0: i32) -> (i32, i32) {
    %c0_i32 = arith.constant 0 : i32
    %c0_i32_0 = arith.constant 0 : i32
    %c0_i32_1 = arith.constant 0 : i32
    return %c0_i32, %c0_i32_0 : i32, i32
  }
  func.func @transform_7(%arg0: i32) -> (i32, i32, i32) {
    %c0_i32 = arith.constant 0 : i32
    %c0_i32_0 = arith.constant 0 : i32
    %c0_i32_1 = arith.constant 0 : i32
    return %arg0, %c0_i32, %c0_i32_0 : i32, i32, i32
  }
}

</mosaic_0001>

<bundles_post_ra>
// kernel: tpu_custom_call.1
= control target key start
LH: loop header
LB: loop body
LE: loop exit
PB: predicated region body
PF: predicated region fallthrough
CT: control target
= control target key end

     0   :  { %s1598_s0 = inlined_call_operand.hbm [shape: bf16[3,16,16], index: 0, kind: input, shape index: {}]   ;;  %s1599_s1 = inlined_call_operand.vmem [shape: f32[3,16,1], index: 1, kind: input, shape index: {}]   ;;  %s1600_s2 = inlined_call_operand.vmem [shape: f32[3,16,128], index: 2, kind: input, shape index: {}]   ;;  %s1601_s3 = inlined_call_operand.hbm [shape: f32[128,128], index: 3, kind: input, shape index: {}]   ;;  %s1602_s4 = inlined_call_operand.vmem [shape: f32[1,128], index: 4, kind: input, shape index: {}]   ;;  %s1603_s5 = inlined_call_operand.hbm [shape: f32[128,128], index: 5, kind: input, shape index: {}]   ;;  %s1604_s6 = inlined_call_operand.vmem [shape: f32[1,128], index: 6, kind: input, shape index: {}]   ;;  %s1605_s7 = inlined_call_operand.hbm [shape: f32[3,16,128], index: 7, kind: output, shape index: {}]  }
   0x1   :  { %1610 = sst [smem:[#allocation12_spill]] %s1601_s3 }
   0x2   :  { %12 = vsyncpa [#allocation3], 0 }
   0x3   :  { %14 = vsyncpa [#allocation3 + $0x1], 0 }
   0x4   :  { %15 = vsyncpa [#allocation6], 0 }
   0x5   :  { %16 = vsyncpa [#allocation4], 0 }
   0x6   :  { %18 = vsyncpa [#allocation4 + $0x1], 0  ;;  %s1362_s24 = smov 0   ;;  %s1364_s25 = smov 0  }
   0x7   :  { %s1366_s26 = smov 0   ;;  %s1368_s27 = smov 0  }
   0x8 LB: > { %s1383_s28 = sadd.s32 4294967295, %s1309_s27   ;;  %s920_s29 = sadd.s32 4294967294, %s1309_s27   ;;  %s1309_s27 = sphi %s1368_s27, %s1628_s27   ;;  %s1305_s26 = sphi %s1366_s26, %s1627_s26   ;;  %s1301_s25 = sphi %s1364_s25, %s1626_s25   ;;  %s1297_s24 = sphi %s1362_s24, %s1625_s24  }
   0x9   : > { %p44_p0 = scmp.ne.s32.totalorder %s1301_s25, %s1297_s24  ;;  %p1606_p1 = scmp.eq.s32.totalorder %s1383_s28, 0 }
   0xa   : > { %p210_p3 = scmp.eq.s32.totalorder %s920_s29, 2  ;;  %p921_p5 = scmp.ge.s32.totalorder %s1309_s27, 1 }
   0xb   : > { %p1392_p4 = por %p1606_p1, %p44_p0  ;;  %p217_p7 = scmp.lt.s32.totalorder %s1309_s27, 4 }
   0xc   : > { %p1397_p6 = por %p210_p3, %p44_p0  ;;  %s1311_s10 = smov [#allocation5]  }
   0xd   : > { %s1611_s30 = scalar_select %p1392_p4, 1, 0 }
   0xe   : > { %s1612_s8 = scalar_select %p1397_p6, 1, 0 }
   0xf   : > { %p1402_p8 = pnand %p921_p5, %p217_p7  ;;  %s229_s11 = sshll.u32 %s1311_s10, 4  ;;  %s230_s11 = int_to_ptr.vmem [resolvable:$true] %s229_s11 }
  0x10   : > { %s1312_s13 = smov [#allocation7]   ;;  %s1172_s15 = scalar_lea.vmem %s230_s11, 2048 }
  0x11   : > { %s1613_s9 = scalar_select %p1402_p8, 1, 0 }
  0x12   : > { %p1096_p9 = pneg %p1402_p8  ;;  %s245_s14 = sshll.u32 %s1312_s13, 4  ;;  %s246_s14 = int_to_ptr.vmem [resolvable:$true] %s245_s14 }
  0x13   : > { %p1173_p12 = scmp.ne.s32.totalorder %s230_s11, %s1172_s15  ;;  %p1180_p3 = scmp.lt.s32.totalorder %s230_s11, %s230_s11 }
  0x14   : > { %p1410_p10 = pnand %p1096_p9, %p1606_p1  ;;  %p1181_p5 = scmp.lt.s32.totalorder %s1172_s15, %s1172_s15 }
  0x16   : > { %p1163_p11 = pneg %p1410_p10  ;;  %p1182_p7 = por %p1181_p5, %p1180_p3 }
  0x18   : > { %p1175_p13 = pnand %p1173_p12, %p1163_p11 }
  0x1a   : > { %p1176_p0 = pneg %p1175_p13 }
  0x1c   : > { %p1183_p9 = pnand %p1182_p7, %p1176_p0 }
  0x1e   : > { %1186 = shalt.err (!%p1183_p9)
}
  0x1f   : > { %s1313_s16 = smov 128   ;;  %s1314_s17 = smov 8  }
  0x20   : > { %s1615_s3 = sld [smem:[#allocation12_spill]]  ;;  %s1198_s20 = scalar_lea.vmem %s246_s14, 2048 }
  0x21   : > { %p1199_p1 = scmp.ne.s32.totalorder %s246_s14, %s1198_s20  ;;  %p1206_p2 = scmp.lt.s32.totalorder %s246_s14, %s246_s14 }
  0x22   : > { %p1207_p6 = scmp.lt.s32.totalorder %s1198_s20, %s1198_s20 }
  0x23   : > { %p1201_p12 = pnand %p1199_p1, %p1163_p11 }
  0x24   : > { %p1208_p3 = por %p1207_p6, %p1206_p2 }
  0x25   : > { %p1202_p13 = pneg %p1201_p12 }
  0x26   : > { %1099 = dma.hbm_to_vmem [thread:$0]  (!%p1410_p10), %s1615_s3, 2048, %s230_s11, [#allocation6], %s1313_s16, %s1313_s16, %s1314_s17  }
  0x27   : > { %p1209_p0 = pnand %p1208_p3, %p1202_p13 }
  0x29   : > { %1212 = shalt.err (!%p1209_p0)
}
  0x2a   : > { %1102 = dma.hbm_to_vmem [thread:$0]  (!%p1410_p10), %s1603_s5, 2048, %s246_s14, [#allocation6], %s1313_s16, %s1313_s16, %s1314_s17  }
  0x2b   : > { %s1433_s23 = sadd.s32 1, %s1309_s27   ;;  %s31_s29 = sadd.s32 1, %s1305_s26 }
  0x2c   : > { %s28_s10 = ssub.s32 %s1309_s27, %s1433_s23  ;;  %p38_p1 = scmp.ne.s32.totalorder %s1305_s26, %s1301_s25 }
  0x2d   : > { %p29_p2 = scmp.eq.s32.totalorder %s28_s10, 0  ;;  %p39_p6 = scmp.eq.s32.totalorder %s1309_s27, 0 }
  0x2e   : > { %p1616_p11 = scmp.eq.s32.totalorder %s1383_s28, 2  ;;  %p1113_p7 = scmp.lt.s32.totalorder %s1309_s27, 3 }
  0x2f   : > { %s1449_s12 = scalar_select %p29_p2, %s1305_s26, %s31_s29  }
  0x30   : > { %p1443_p5 = por %p1616_p11, %p38_p1  ;;  %p40_p9 = por %p39_p6, %p38_p1 }
  0x31   : > { %s262_s13 = sand.u32 1, %s1305_s26   ;;  %s948_s14 = sshll.u32 %s1309_s27, 7 }
  0x32   : > { %s1617_s11 = scalar_select %p1443_p5, 1, 0 }
  0x33   : > { %s925_s15 = sshll.u32 %s262_s13, 3  ;;  %s1456_s18 = scalar_lea.hbm %s1598_s0, %s948_s14 }
  0x34   : > { %s266_s19 = scalar_lea.vmem [#allocation2], %s925_s15  ;;  %p1460_p10 = pnand %p1113_p7, %p40_p9 }
  0x35   : > { %s273_s20 = sshll.u32 %s266_s19, 4  ;;  %s1464_s22 = scalar_lea.sflag [#allocation3], %s262_s13  ;;  %s1458_s20 = int_to_ptr.vmem [resolvable:$true] %s273_s20 }
  0x36   : > { %s1213_s29 = scalar_lea.hbm %s1456_s18, 128  ;;  %p1215_p13 = pneg %p1460_p10 }
  0x37   : > { %p1214_p12 = scmp.ne.s32.totalorder %s1456_s18, %s1213_s29  ;;  %s1218_s15 = scalar_lea.hbm %s1598_s0, 384 }
  0x38   : > { %p1219_p1 = scmp.lt.s32.totalorder %s1456_s18, %s1598_s0  ;;  %p1220_p2 = scmp.lt.s32.totalorder %s1218_s15, %s1213_s29 }
  0x39   : > { %p1216_p3 = pnand %p1215_p13, %p1214_p12 }
  0x3a   : > { %p1221_p6 = por %p1220_p2, %p1219_p1 }
  0x3b   : > { %p1217_p0 = pneg %p1216_p3 }
  0x3d   : > { %p1222_p11 = pnand %p1221_p6, %p1217_p0 }
  0x3f   : > { %1225 = shalt.err (!%p1222_p11)
}
  0x40   : > { %s1226_s13 = scalar_lea.vmem %s1458_s20, 128  ;;  %s1315_s19 = smov [#allocation2]  }
  0x41   : > { %p1227_p7 = scmp.ne.s32.totalorder %s1458_s20, %s1226_s13  ;;  %s1231_s3 = sshll.u32 %s1315_s19, 4  ;;  %s1232_s3 = int_to_ptr.vmem [resolvable:$false] %s1231_s3 }
  0x42   : > { %s1233_s10 = scalar_lea.vmem %s1232_s3, 256  ;;  %p1234_p3 = scmp.lt.s32.totalorder %s1458_s20, %s1232_s3 }
  0x43   : > { %p1229_p9 = pnand %p1227_p7, %p1215_p13  ;;  %p1235_p5 = scmp.lt.s32.totalorder %s1233_s10, %s1226_s13 }
  0x45   : > { %p1230_p12 = pneg %p1229_p9  ;;  %p1236_p4 = por %p1235_p5, %p1234_p3 }
  0x47   : > { %p1237_p8 = pnand %p1236_p4, %p1230_p12 }
  0x49   : > { %1240 = shalt.err (!%p1237_p8)
}
  0x4a   : > { %s1316_s29 = smov 64   ;;  %s1317_s14 = smov 4  }
  0x4b   : > { %1106 = dma.hbm_to_vmem [thread:$0]  (!%p1460_p10), %s1456_s18, 128, %s1458_s20, %s1464_s22, %s1316_s29, %s1316_s29, %s1317_s14  }
  0x4c   : > { %p1619_p13 = scmp.ne.s32.totalorder %s1613_s9, 0 }
  0x4d   : > { %s1488_s15 = sand.u32 (!%p1619_p13), 1, %s1301_s25   ;;  %p1620_p4 = scmp.ne.s32.totalorder (!%p1619_p13), %s1611_s30, 0 }
  0x4e   : > { %301 = sbr.rel (%p1619_p13) target bundleno = 1093 (0x445), region = 48  ;;  %s929_s3 = sshll.u32 (!%p1619_p13), %s1488_s15, 3 }
  0x4f   : > { %s304_s16 = scalar_lea.sflag (!%p1619_p13), [#allocation3], %s1488_s15  ;;  %s307_s17 = scalar_lea.vmem (!%p1619_p13), [#allocation2], %s929_s3 }
  0x53   : > { %1284 = dma.done.wait (%p1620_p4), %s304_s16, 128  }
  0x54   : > { %1286 = vsyncadd (%p1620_p4), %s304_s16, 4294967168  ;;  %p1621_p8 = scmp.eq.s32.totalorder %s1383_s28, 0 }
  0x56   : > { %1288 = dma.done.wait (%p1621_p8), [#allocation6], 4096   ;;  %p1622_p5 = pmov %p1621_p8 }
  0x57   : > { %p356_p10 = scmp.lt.s32.totalorder %s1383_s28, 2  ;;  %v1318_v0 = vmov 0   ;;  %v1510_v2 = vld [vmem:[%s307_s17] sm:$0xff]   ;;  %vm386_vm0 = vcmask 130048   ;;  %v483_v7 = vld [vmem:[#allocation5 + $0x68] sm:$0xff]  ;;  %v482_v8 = vld [vmem:[#allocation5 + $0x60] sm:$0xff]  ;;  %v751_v59 = vlaneseq }
  0x58   : > { %1290 = vsyncadd (%p1622_p5), [#allocation6], 4294963200  ;;  %1158 = vset.pattern.permute.xlu0 %v1318_v0  ;;  %v954_v4 = vunpack.c.l.bf16 %v1510_v2  ;;  %v485_v5 = vld [vmem:[#allocation5 + $0x78] sm:$0xff]  ;;  %v484_v6 = vld [vmem:[#allocation5 + $0x70] sm:$0xff]  ;;  %v955_v24 = vunpack.c.h.bf16 %v1510_v2  ;;  %s932_s16 = sshll.u32 %s1488_s15, 4  ;;  %s951_s17 = sshll.u32 %s1383_s28, 8 }
  0x59   : > { %s1502_s9 = scalar_select %p356_p10, %s1383_s28, 2  ;;  %1007 = vmatprep.subr.mxu1 %v485_v5  ;;  %v481_v9 = vld [vmem:[#allocation5 + $0x58] sm:$0xff]  ;;  %v480_v10 = vld [vmem:[#allocation5 + $0x50] sm:$0xff]  ;;  %v479_v11 = vld [vmem:[#allocation5 + $0x48] sm:$0xff]  ;;  %v752_v60 = vshrl.u32 %v751_v59, 7 }
  0x5a   : > { %1004 = vmatprep.mubr.msk.f32.mxu0 %vm386_vm0, %v954_v4  ;;  %1008 = vmatpush3.msra.mxu1 %v485_v5  ;;  %v478_v12 = vld [vmem:[#allocation5 + $0x40] sm:$0xff]  ;;  %v477_v13 = vld [vmem:[#allocation5 + $0x38] sm:$0xff]  ;;  %v476_v14 = vld [vmem:[#allocation5 + $0x30] sm:$0xff]  ;;  %s791_s22 = scalar_lea.sflag [#allocation4], %s1488_s15  ;;  %p1623_p1 = scmp.ne.s32.totalorder %s1617_s11, 0 }
  0x5b   : > { %s949_s18 = sshll.u32 %s1502_s9, 4  ;;  %1009 = vmatprep.subr.mxu1 %v484_v6  ;;  %v475_v15 = vld [vmem:[#allocation5 + $0x28] sm:$0xff]  ;;  %v474_v16 = vld [vmem:[#allocation5 + $0x20] sm:$0xff]  ;;  %v473_v17 = vld [vmem:[#allocation5 + $0x18] sm:$0xff]  ;;  %v753_v63 = vadd.s32 8, %v752_v60  ;;  %s355_s9 = scalar_lea.vmem [#allocation8], %s932_s16 }
  0x5c   : > { %s360_s21 = scalar_lea.vmem %s1599_s1, %s949_s18  ;;  %1010 = vmatpush3.msra.mxu1 %v484_v6  ;;  %s365_s19 = scalar_lea.vmem %s1600_s2, %s949_s18  ;;  %v472_v25 = vld [vmem:[#allocation5 + $0x10] sm:$0xff]  ;;  %v471_v26 = vld [vmem:[#allocation5 + $0x8] sm:$0xff]  ;;  %v470_v27 = vld [vmem:[#allocation5] sm:$0xff] }
  0x5d   : > { %v371_v1 = vld [vmem:[%s360_s21 + $0x8] sm:$0xff]  ;;  %v370_v3 = vld [vmem:[%s360_s21] sm:$0xff]  ;;  %1011 = vmatprep.subr.mxu1 %v483_v7  ;;  %v585_v30 = vld [vmem:[#allocation7 + $0x68] sm:$0xff]  ;;  %vm755_vm1 = vcmp.lt.s32.totalorder %v753_v63, 12  ;;  %s804_s18 = sshll.u32 %s355_s9, 4  ;;  %s1554_s21 = scalar_lea.hbm %s1605_s7, %s951_s17  ;;  %s1556_s18 = int_to_ptr.vmem [resolvable:$true] %s804_s18 }
  0x5e   : > { %381 = vperm.xlu0 %1158, %v371_v1   ;;  %1012 = vmatpush3.msra.mxu1 %v483_v7  ;;  %v373_v18 = vld [vmem:[%s365_s19 + $0x8] sm:$0xff]  ;;  %v372_v21 = vld [vmem:[%s365_s19] sm:$0xff]  ;;  %v584_v31 = vld [vmem:[#allocation7 + $0x60] sm:$0xff]  ;;  %s1241_s13 = scalar_lea.vmem %s1556_s18, 256  ;;  %s1319_s28 = smov [#allocation8]  }
  0x5f   : > { %1013 = vmatprep.subr.mxu1 %v482_v8  ;;  %v587_v28 = vld [vmem:[#allocation7 + $0x78] sm:$0xff]  ;;  %v586_v29 = vld [vmem:[#allocation7 + $0x70] sm:$0xff]  ;;  %v581_v34 = vld [vmem:[#allocation7 + $0x48] sm:$0xff]  ;;  %p1242_p0 = scmp.ne.s32.totalorder %s1556_s18, %s1241_s13  ;;  %s1245_s19 = sshll.u32 %s1319_s28, 4  ;;  %s1246_s19 = int_to_ptr.vmem [resolvable:$false] %s1245_s19 }
  0x60   : > { %1014 = vmatpush3.msra.mxu1 %v482_v8  ;;  %v583_v32 = vld [vmem:[#allocation7 + $0x58] sm:$0xff]  ;;  %v582_v33 = vld [vmem:[#allocation7 + $0x50] sm:$0xff]  ;;  %v580_v35 = vld [vmem:[#allocation7 + $0x40] sm:$0xff]  ;;  %s1247_s10 = scalar_lea.vmem %s1246_s19, 512  ;;  %p1248_p11 = scmp.lt.s32.totalorder %s1556_s18, %s1246_s19 }
  0x61   : > { %1015 = vmatprep.subr.mxu1 %v481_v9  ;;  %v579_v36 = vld [vmem:[#allocation7 + $0x38] sm:$0xff]  ;;  %v578_v37 = vld [vmem:[#allocation7 + $0x30] sm:$0xff]  ;;  %v577_v38 = vld [vmem:[#allocation7 + $0x28] sm:$0xff]  ;;  %p1243_p2 = pnand %p1242_p0, %p1623_p1  ;;  %p1249_p7 = scmp.lt.s32.totalorder %s1247_s10, %s1241_s13 }
  0x62   : > { %376 = vperm.xlu0 %1158, %v370_v3   ;;  %1016 = vmatpush3.msra.mxu1 %v481_v9  ;;  %v576_v43 = vld [vmem:[#allocation7 + $0x20] sm:$0xff]  ;;  %v575_v44 = vld [vmem:[#allocation7 + $0x18] sm:$0xff]  ;;  %v574_v45 = vld [vmem:[#allocation7 + $0x10] sm:$0xff] }
  0x63   : > { %1017 = vmatprep.subr.mxu1 %v480_v10  ;;  %v573_v46 = vld [vmem:[#allocation7 + $0x8] sm:$0xff]  ;;  %v572_v47 = vld [vmem:[#allocation7] sm:$0xff]  ;;  %v939_v48 = vld [vmem:[%s1602_s4] ss:$0 sm:$0xff]  ;;  %p1244_p6 = pneg %p1243_p2  ;;  %p1250_p9 = por %p1249_p7, %p1248_p11 }
  0x64   : > { %1018 = vmatpush3.msra.mxu1 %v480_v10  ;;  %v942_v62 = vld [vmem:[%s1604_s6] ss:$0 sm:$0xff] }
  0x65   : > { %1019 = vmatprep.subr.mxu1 %v479_v11  ;;  %p1251_p12 = pnand %p1250_p9, %p1244_p6 }
  0x66   : > { %1020 = vmatpush3.msra.mxu1 %v479_v11 }
  0x67   : > { %1021 = vmatprep.subr.mxu1 %v478_v12 }
  0x68   : > { %1022 = vmatpush3.msra.mxu1 %v478_v12 }
  0x69   : > { %1023 = vmatprep.subr.mxu1 %v477_v13 }
  0x6a   : > { %1024 = vmatpush3.msra.mxu1 %v477_v13 }
  0x6b   : > { %1025 = vmatprep.subr.mxu1 %v476_v14 }
  0x6c   : > { %1026 = vmatpush3.msra.mxu1 %v476_v14 }
  0x6d   : > { %1027 = vmatprep.subr.mxu1 %v475_v15 }
  0x6e   : > { %1028 = vmatpush3.msra.mxu1 %v475_v15 }
  0x6f   : > { %1029 = vmatprep.subr.mxu1 %v474_v16 }
  0x70   : > { %1030 = vmatpush3.msra.mxu1 %v474_v16 }
  0x71   : > { %1031 = vmatprep.subr.mxu1 %v473_v17 }
  0x72   : > { %1032 = vmatpush3.msra.mxu1 %v473_v17 }
  0x73   : > { %1033 = vmatprep.subr.mxu1 %v472_v25 }
  0x74   : > { %1034 = vmatpush3.msra.mxu1 %v472_v25 }
  0x75   : > { %1035 = vmatprep.subr.mxu1 %v471_v26 }
  0x76   : > { %1036 = vmatpush3.msra.mxu1 %v471_v26 }
  0x77   : > { %1037 = vmatprep.subr.mxu1 %v470_v27 }
  0x78   : > { %1038 = vmatpush3.msra.mxu1 %v470_v27 }
  0xd9   : > { %v1521_v19 = vpop.permute.xlu0 %381 }
  0xda   : > { %v385_v20 = vmul.f32 %v1521_v19, %v373_v18 }
  0xdc   : > { %1000 = vmatprep.subr.mxu0 %v385_v20 }
  0xdd   : > { %1001 = vmatpush3.msra.mxu0 %v385_v20  ;;  %v1524_v22 = vpop.permute.xlu0 %376 }
  0xde   : > { %v384_v23 = vmul.f32 %v1524_v22, %v372_v21 }
  0xe0   : > { %1002 = vmatprep.subr.mxu0 %v384_v23 }
  0xe1   : > { %1003 = vmatpush3.msra.mxu0 %v384_v23 }
  0xe2   : > { %1005 = vmatmul.mubr.msk.f32.vlgmr.msra.gmra.mxu0 %vm386_vm0, %v955_v24  ;;  %1042 = vmatprep.subr.mxu0 %v587_v28 }
  0xe3   : > { %1043 = vmatpush3.msra.mxu0 %v587_v28 }
  0xe4   : > { %1044 = vmatprep.subr.mxu0 %v586_v29 }
  0xe5   : > { %1045 = vmatpush3.msra.mxu0 %v586_v29 }
  0xe6   : > { %1046 = vmatprep.subr.mxu0 %v585_v30 }
  0xe7   : > { %1047 = vmatpush3.msra.mxu0 %v585_v30 }
  0xe8   : > { %1048 = vmatprep.subr.mxu0 %v584_v31 }
  0xe9   : > { %1049 = vmatpush3.msra.mxu0 %v584_v31 }
  0xea   : > { %1050 = vmatprep.subr.mxu0 %v583_v32 }
  0xeb   : > { %1051 = vmatpush3.msra.mxu0 %v583_v32 }
  0xec   : > { %1052 = vmatprep.subr.mxu0 %v582_v33 }
  0xed   : > { %1053 = vmatpush3.msra.mxu0 %v582_v33 }
  0xee   : > { %1054 = vmatprep.subr.mxu0 %v581_v34 }
  0xef   : > { %1055 = vmatpush3.msra.mxu0 %v581_v34 }
  0xf0   : > { %1056 = vmatprep.subr.mxu0 %v580_v35 }
  0xf1   : > { %1057 = vmatpush3.msra.mxu0 %v580_v35 }
  0xf2   : > { %1058 = vmatprep.subr.mxu0 %v579_v36 }
  0xf3   : > { %1059 = vmatpush3.msra.mxu0 %v579_v36 }
  0xf4   : > { %1060 = vmatprep.subr.mxu0 %v578_v37 }
  0xf5   : > { %1061 = vmatpush3.msra.mxu0 %v578_v37 }
  0xf6   : > { %1062 = vmatprep.subr.mxu0 %v577_v38 }
  0xf7   : > { %1063 = vmatpush3.msra.mxu0 %v577_v38 }
  0xf8   : > { %1064 = vmatprep.subr.mxu0 %v576_v43 }
  0xf9   : > { %1065 = vmatpush3.msra.mxu0 %v576_v43 }
  0xfa   : > { %1066 = vmatprep.subr.mxu0 %v575_v44 }
  0xfb   : > { %1067 = vmatpush3.msra.mxu0 %v575_v44 }
  0xfc   : > { %1068 = vmatprep.subr.mxu0 %v574_v45 }
  0xfd   : > { %1069 = vmatpush3.msra.mxu0 %v574_v45 }
  0xfe   : > { %1070 = vmatprep.subr.mxu0 %v573_v46 }
  0xff   : > { %1071 = vmatpush3.msra.mxu0 %v573_v46 }
 0x100   : > { %1072 = vmatprep.subr.mxu0 %v572_v47 }
 0x101   : > { %1073 = vmatpush3.msra.mxu0 %v572_v47 }
 0x1a2   : > { %v1006_v39 = vpop.f32.mrf.mxu0 }
 0x1a3   : > { %v469_v42 = vmul.f32 %v1006_v39, %v1521_v19 }
 0x1a4   : > { %v459_v40 = vpop.f32.mrf.mxu0 }
 0x1a5   : > { %v468_v41 = vmul.f32 %v459_v40, %v1524_v22 }
 0x1a7   : > { %1039 = vmatprep.mubr.f32.mxu1 %v468_v41 }
 0x1a8   : > { %1040 = vmatmul.mubr.f32.vlgmr.msra.gmra.mxu1 %v469_v42 }
 0x1a9   : > { %1081 = vmatprep.mubr.msk.f32.mxu1 %vm386_vm0, %v954_v4 }
 0x268   : > { %v1041_v49 = vpop.f32.mrf.mxu1 }
 0x269   : > { %v565_v50 = vadd.f32 %v1041_v49, %v939_v48 }
 0x26a   : > { %v559_v51 = vpop.f32.mrf.mxu1 }
 0x26b   : > { %v560_v52 = vadd.f32 %v939_v48, %v559_v51  ;;  %v569_v53 = vmax.f32 %v565_v50, 0.0 }
 0x26d   : > { %v568_v54 = vmax.f32 %v560_v52, 0.0  ;;  %v571_v56 = vmul.f32 %v569_v53, %v1521_v19 }
 0x26f   : > { %v570_v55 = vmul.f32 %v568_v54, %v1524_v22 }
 0x271   : > { %1074 = vmatprep.mubr.f32.mxu0 %v570_v55 }
 0x272   : > { %1075 = vmatmul.mubr.f32.vlgmr.msra.gmra.mxu0 %v571_v56 }
 0x332   : > { %v1076_v57 = vpop.f32.mrf.mxu0 }
 0x333   : > { %1077 = vmatprep.subr.mxu1 %v1076_v57 }
 0x334   : > { %v654_v58 = vpop.f32.mrf.mxu0  ;;  %1078 = vmatpush3.msra.mxu1 %v1076_v57 }
 0x335   : > { %1079 = vmatprep.subr.mxu1 %v654_v58 }
 0x336   : > { %1080 = vmatpush3.msra.mxu1 %v654_v58 }
 0x337   : > { %1082 = vmatmul.mubr.msk.f32.vlgmr.msra.gmra.mxu1 %vm386_vm0, %v955_v24 }
 0x3f7   : > { %v1083_v61 = vpop.f32.mrf.mxu1 }
 0x3f8   : > { %v739_v0 = vmul.f32 %v1083_v61, %v1521_v19 }
 0x3f9   : > { %v729_v1 = vpop.f32.mrf.mxu1 }
 0x3fa   : > { %v748_v3 = vadd.f32 %v942_v62, %v739_v0  ;;  %v738_v4 = vmul.f32 %v729_v1, %v1524_v22 }
 0x3fc   : > { %v750_v5 = vmax.f32 %v748_v3, 0.0  ;;  %v747_v6 = vadd.f32 %v942_v62, %v738_v4 }
 0x3fe   : > { %v761_v2 = vsel %vm755_vm1, %v750_v5, 0.0  ;;  %v749_v7 = vmax.f32 %v747_v6, 0.0 }
 0x400   : > { %v762_v8 = vadd.f32 %v761_v2, %v749_v7 }
 0x402   : > { %v763_v9 = vrot.slane %v762_v8, 4 }
 0x404   : > { %v764_v10 = vadd.f32 %v763_v9, %v762_v8 }
 0x406   : > { %v765_v11 = vrot.slane %v764_v10, 2 }
 0x408   : > { %v766_v12 = vadd.f32 %v765_v11, %v764_v10 }
 0x40a   : > { %v767_v13 = vrot.slane %v766_v12, 1 }
 0x40c   : > { %v768_v14 = vadd.f32 %v767_v13, %v766_v12 }
 0x40e   : > { %v769_v15 = vmul.f32 0.083333336, %v768_v14 }
 0x410   : > { %v770_v16 = vsub.f32 %v749_v7, %v769_v15  ;;  %v771_v17 = vsub.f32 %v761_v2, %v769_v15 }
 0x412   : > { %v773_v18 = vsel %vm755_vm1, %v771_v17, 0.0  ;;  %v774_v19 = vmul.f32 %v770_v16, %v770_v16 }
 0x413   : > { %v775_v20 = vmul.f32 %v773_v18, %v773_v18 }
 0x415   : > { %v776_v21 = vadd.f32 %v775_v20, %v774_v19 }
 0x417   : > { %v777_v22 = vrot.slane %v776_v21, 4 }
 0x419   : > { %v778_v23 = vadd.f32 %v777_v22, %v776_v21 }
 0x41b   : > { %v779_v24 = vrot.slane %v778_v23, 2 }
 0x41d   : > { %v780_v25 = vadd.f32 %v779_v24, %v778_v23 }
 0x41f   : > { %v781_v26 = vrot.slane %v780_v25, 1 }
 0x421   : > { %v782_v27 = vadd.f32 %v781_v26, %v780_v25 }
 0x423   : > { %v783_v28 = vmul.f32 0.083333336, %v782_v27 }
 0x425   : > { %v784_v29 = vmax.f32 %v783_v28, 0.01 }
 0x427   : > { %1159 = vrsqrt.f32 %v784_v29 }
 0x434   : > { %v1160_v30 = vpop.eup %1159 }
 0x435   : > { %v786_v31 = vmul.f32 %v1160_v30, %v770_v16  ;;  %v787_v32 = vmul.f32 %v1160_v30, %v771_v17 }
 0x437   : > { %788 = vst [vmem:[%s355_s9] sm:$0xff] %v786_v31  ;;  %789 = vst [vmem:[%s355_s9 + $0x8] sm:$0xff] %v787_v32 }
 0x438   : > { %1254 = shalt.err (!%p1251_p12)
}
 0x439   : > { %s1255_s29 = scalar_lea.hbm %s1554_s21, 256  ;;  %s1259_s16 = scalar_lea.hbm %s1605_s7, 768 }
 0x43a   : > { %p1256_p3 = scmp.ne.s32.totalorder %s1554_s21, %s1255_s29  ;;  %p1260_p8 = scmp.lt.s32.totalorder %s1554_s21, %s1605_s7 }
 0x43b   : > { %p1261_p5 = scmp.lt.s32.totalorder %s1259_s16, %s1255_s29 }
 0x43c   : > { %p1257_p13 = pnand %p1256_p3, %p1623_p1 }
 0x43d   : > { %p1262_p10 = por %p1261_p5, %p1260_p8 }
 0x43e   : > { %p1258_p4 = pneg %p1257_p13 }
 0x440   : > { %p1263_p0 = pnand %p1262_p10, %p1258_p4 }
 0x442   : > { %1266 = shalt.err (!%p1263_p0)
}
 0x443   : > { %s1320_s20 = smov 128   ;;  %s1321_s30 = smov 8  }
 0x444   : > { %1094 = dma.vmem_to_hbm [thread:$0]  (%p1623_p1), %s1556_s18, 256, %s1554_s21, %s791_s22, %s1320_s20, %s1320_s20, %s1321_s30  }
 0x445 PF: > { %p1116_p2 = scmp.ge.s32.totalorder %s1309_s27, 2  ;;  %s819_s13 = sand.u32 1, %s1297_s24  }
 0x446   : > { %p1624_p6 = scmp.ne.s32.totalorder %s1612_s8, 0  ;;  %s820_s28 = scalar_lea.sflag [#allocation4], %s819_s13 }
 0x448   : > { %p1108_p11 = pnand %p1116_p2, %p1624_p6 }
 0x44a   : > { %p1109_p7 = pneg %p1108_p11 }
 0x44c   : > { %1292 = dma.done.wait (%p1109_p7), %s820_s28, 256  }
 0x44d   : > { %1294 = vsyncadd (%p1109_p7), %s820_s28, 4294967040  ;;  %p21_p9 = scmp.ge.s32.totalorder %s1433_s23, 5   ;;  %s1625_s24 = smov %s1301_s25 }
 0x44e   : > { %s1626_s25 = smov %s1305_s26  ;;  %s1627_s26 = smov %s1449_s12 }
 0x44f   : > { %s1628_s27 = smov %s1433_s23  ;;  %23 = sbr.rel (!%p21_p9) target bundleno = 8 (0x8), region = 107 }
 0x454   :  { %825 = vsyncpa [#allocation3], 1 }
 0x455   :  { %827 = vsyncpa [#allocation3 + $0x1], 1 }
 0x456   :  { %828 = vsyncpa [#allocation6], 1 }
 0x457   :  { %829 = vsyncpa [#allocation4], 1 }
 0x458   :  { %831 = vsyncpa [#allocation4 + $0x1], 1 }

</bundles_post_ra>
